<compile_context>
chip_gen: v7x
topology: tpu7x:2x2x1
jax: 0.10.0
libtpu: 0.0.40
codegen_flags: <defaults>
</compile_context>

<pallas_src>
import functools

import jax
import jax.numpy as jnp
from jax import lax
from jax.experimental import pallas as pl
from jax.experimental.pallas import tpu as pltpu

_QUEUE = 32              # outstanding row DMAs (rolling window depth, pow2)
_ROWS_PER_STEP = 512     # max rows handled per grid step (pow2)
_MAX_IDS_PER_CALL = 32768  # cap on SMEM-prefetched ids per pallas_call
_STEADY_UNROLL = 4       # unroll factor of the descriptor-issue loop


def _bucket(n: int) -> int:
    """Round n up to a power of two (min 8) to bound recompiles."""
    return max(8, 1 << (max(n, 1) - 1).bit_length())


def _rows_per_step(n_pad: int) -> int:
    """Rows per grid step: at least two steps when possible (feeds both v7x
    TensorCores) while keeping blocks large enough that the q-deep
    prologue/epilogue drain stays small on single-TC v5e/v6e."""
    return max(8, min(_ROWS_PER_STEP, n_pad // 2))


# ---------------------------------------------------------------------------
# Pallas kernels
# ---------------------------------------------------------------------------

def _gather_kernel(nid_ref, store_ref, out_ref, sems):
    """Gather store[nid[base+j]] -> out_block[j] with per-row HBM->VMEM DMAs.

    out_ref is the blocked VMEM output tile (rows, D); its coalesced write-back
    to HBM is handled (and double-buffered) by the Pallas pipeline.
    """
    rows = out_ref.shape[0]            # static rows per grid step (pow2, >=8)
    q = min(_QUEUE, rows)              # rolling DMA window depth (pow2)
    base = pl.program_id(0) * rows     # first SMEM id index of this step

    def start_row(src_id, local_row, slot):
        pltpu.make_async_copy(store_ref.at[src_id],     # (D,) HBM row
                              out_ref.at[local_row],    # (D,) VMEM row
                              sems.at[slot]).start()

    def wait_slot(slot):
        # Dummy descriptor with the identical (D,) shape / byte count: only the
        # semaphore and transfer size matter for .wait().
        pltpu.make_async_copy(store_ref.at[0], out_ref.at[0],
                              sems.at[slot]).wait()

    def prologue(j, carry):
        start_row(nid_ref[base + j], j, j)
        return carry
    lax.fori_loop(0, q, prologue, None, unroll=True)

    if rows > q:
        def steady(j, carry):
            # Hoist SMEM reads / scalar math above the wait: .wait() breaks
            # SMEM store->load forwarding even for untouched addresses.
            src_id = nid_ref[base + j]
            slot = j & (q - 1)
            wait_slot(slot)
            start_row(src_id, j, slot)
            return carry
        lax.fori_loop(q, rows, steady, None, unroll=_STEADY_UNROLL)

    def epilogue(slot, carry):
        wait_slot(slot)
        return carry
    lax.fori_loop(0, q, epilogue, None, unroll=True)


def _scatter_kernel(nid_ref, nvalid_ref, x_ref, store_in_ref, store_out_ref,
                    sems, *, rows):
    """Scatter x[min(i, n_valid-1)] -> store[nid[i]] in place (HBM->HBM rows).

    Ids are padded on the host (edge mode) but x is NOT: the source row index
    is clamped to n_valid-1, so padded iterations re-write the last valid row
    with identical data (harmless regardless of DMA completion order).
    """
    del store_in_ref                   # same HBM buffer as store_out_ref
    q = min(_QUEUE, rows)
    base = pl.program_id(0) * rows
    last = nvalid_ref[0] - 1           # last valid x row

    def start_row(src_row, dst_id, slot):
        pltpu.make_async_copy(x_ref.at[src_row],          # (D,) HBM row
                              store_out_ref.at[dst_id],   # (D,) HBM row
                              sems.at[slot]).start()

    def wait_slot(slot):
        pltpu.make_async_copy(x_ref.at[0], store_out_ref.at[0],
                              sems.at[slot]).wait()

    def prologue(j, carry):
        i = base + j
        start_row(jnp.minimum(i, last), nid_ref[i], j)
        return carry
    lax.fori_loop(0, q, prologue, None, unroll=True)

    if rows > q:
        def steady(j, carry):
            i = base + j
            dst_id = nid_ref[i]                    # SMEM read before wait
            src_row = jnp.minimum(i, last)
            slot = j & (q - 1)
            wait_slot(slot)
            start_row(src_row, dst_id, slot)
            return carry
        lax.fori_loop(q, rows, steady, None, unroll=_STEADY_UNROLL)

    def epilogue(slot, carry):
        wait_slot(slot)
        return carry
    lax.fori_loop(0, q, epilogue, None, unroll=True)


# ---------------------------------------------------------------------------
# pallas_call wrappers
# ---------------------------------------------------------------------------

@jax.jit
def _pull_rows(store, flat_ids):
    """Gather rows of `store` ([L*N, D]) at flat ids ([n_pad] int32)."""
    n_pad = flat_ids.shape[0]
    d = store.shape[1]
    rows = _rows_per_step(n_pad)
    return pl.pallas_call(
        _gather_kernel,
        out_shape=jax.ShapeDtypeStruct((n_pad, d), store.dtype),
        grid_spec=pltpu.PrefetchScalarGridSpec(
            num_scalar_prefetch=1,
            grid=(n_pad // rows,),
            in_specs=[pl.BlockSpec(memory_space=pl.ANY)],    # store stays HBM
            # Blocked (VMEM) output: scattered rows land in a staging tile,
            # written back with one large pipelined VMEM->HBM DMA per step.
            out_specs=pl.BlockSpec((rows, d), lambda i, ids: (i, 0)),
            scratch_shapes=[pltpu.SemaphoreType.DMA((_QUEUE,))]),
        compiler_params=pltpu.CompilerParams(
            # disjoint row blocks per step -> safe to split over v7x's 2 TCs
            dimension_semantics=("parallel",)),
    )(flat_ids, store)


@functools.partial(jax.jit, donate_argnums=(0,))
def _push_rows(store, x, flat_ids, n_valid):
    """Scatter rows of `x` ([n, D]) into `store` ([L*N, D]) in place."""
    n_pad = flat_ids.shape[0]
    rows = _rows_per_step(n_pad)
    kernel = functools.partial(_scatter_kernel, rows=rows)
    return pl.pallas_call(
        kernel,
        out_shape=jax.ShapeDtypeStruct(store.shape, store.dtype),
        grid_spec=pltpu.PrefetchScalarGridSpec(
            num_scalar_prefetch=2,
            grid=(n_pad // rows,),
            in_specs=[pl.BlockSpec(memory_space=pl.ANY),     # x rows (HBM)
                      pl.BlockSpec(memory_space=pl.ANY)],    # old store (alias)
            out_specs=pl.BlockSpec(memory_space=pl.ANY),
            scratch_shapes=[pltpu.SemaphoreType.DMA((_QUEUE,))]),
        # operand order is (flat_ids, n_valid, x, store); alias indices count
        # the scalar-prefetch operands too -> index 3 == store -> output 0.
        input_output_aliases={3: 0},
        compiler_params=pltpu.CompilerParams(
            # unique ids => disjoint writes => safe on v7x's 2 TCs; no-op on
            # single-TC v5e/v6e.
            dimension_semantics=("parallel",)),
    )(flat_ids, n_valid, x, store)


# ---------------------------------------------------------------------------
# DBHistory: JAX/Pallas port of the PyTorch module
# ---------------------------------------------------------------------------

class DBHistory:
    """Historical embedding storage; dense HBM array replaces RocksDB."""

    def __init__(self, num_nodes: int, num_layers: int, embedding_dim: int,
                 multi_db: bool = False, dtype=jnp.float32):
        self.num_nodes = num_nodes
        self.num_layers = num_layers
        self.embedding_dim = embedding_dim
        self.multi_db = multi_db  # key-scheme flag only; storage is flat anyway
        # TODO(synk): RocksDB persistence / torch.save serialization have no
        # Pallas equivalent; the store lives as a dense on-device array.
        self._store = jnp.zeros((num_layers * num_nodes, embedding_dim),
                                dtype=dtype)

    def reset_parameters(self):
        self._store = jnp.zeros_like(self._store)

    def _flat_ids(self, node_ids, layer: int):
        node_ids = jnp.asarray(node_ids, dtype=jnp.int32).reshape(-1)
        node_ids = jnp.clip(node_ids, 0, self.num_nodes - 1)  # guard OOB ids
        return node_ids + jnp.int32(layer * self.num_nodes)

    # -- pull ----------------------------------------------------------------
    def pull(self, n_id, layer: int):
        n_id = jnp.asarray(n_id, dtype=jnp.int32).reshape(-1)
        n = int(n_id.shape[0])
        if n == 0:
            return jnp.zeros((0, self.embedding_dim), self._store.dtype)
        flat = self._flat_ids(n_id, layer)
        outs = []
        start = 0
        while start < n:                       # chunk to bound SMEM id arrays
            end = min(n, start + _MAX_IDS_PER_CALL)
            cnt = end - start
            ids_c = flat if (start == 0 and end == n) else flat[start:end]
            n_pad = _bucket(cnt)
            if n_pad != cnt:
                ids_c = jnp.pad(ids_c, (0, n_pad - cnt), mode="edge")
            out_c = _pull_rows(self._store, ids_c)
            outs.append(out_c if n_pad == cnt else out_c[:cnt])
            start = end
        out = outs[0] if len(outs) == 1 else jnp.concatenate(outs, axis=0)
        if n == 1:                      # match torch: squeeze single-row pulls
            out = out[0]
        return out

    # -- push ----------------------------------------------------------------
    def _push_flat(self, x, flat):
        """Chunked in-place row scatter; x unpadded, ids padded per bucket."""
        n = int(flat.shape[0])
        assert int(x.shape[0]) == n
        start = 0
        while start < n:
            end = min(n, start + _MAX_IDS_PER_CALL)
            cnt = end - start
            whole = (start == 0 and end == n)
            ids_c = flat if whole else flat[start:end]
            x_c = x if whole else x[start:end]
            n_pad = _bucket(cnt)
            if n_pad != cnt:
                # Pad only the int32 ids (edge mode: last id repeated); padded
                # iterations re-write the last valid row -> identical data.
                ids_c = jnp.pad(ids_c, (0, n_pad - cnt), mode="edge")
            self._store = _push_rows(self._store, x_c, ids_c,
                                     jnp.asarray([cnt], dtype=jnp.int32))
            start = end

    def push(self, x, n_id=None, layer: int = None, offset=None, count=None):
        x = jnp.asarray(x, dtype=self._store.dtype)
        if x.ndim == 1:
            x = x[None, :]

        if offset is not None and count is not None:
            # (offset, count) form: expand to per-row destination node ids on
            # device (no host sync, no per-pattern Mosaic recompiles), then
            # reuse the row scatter.  Assumes x.shape[0] == sum(count), as the
            # torch module does.
            offset = jnp.asarray(offset, dtype=jnp.int32).reshape(-1)
            count = jnp.asarray(count, dtype=jnp.int32).reshape(-1)
            n = int(x.shape[0])
            if n == 0 or int(offset.shape[0]) == 0:
                return
            cum = jnp.cumsum(count)
            prev = cum - count
            idx = jnp.arange(n, dtype=jnp.int32)
            chunk = jnp.searchsorted(cum, idx, side="right")
            chunk = jnp.minimum(chunk, offset.shape[0] - 1).astype(jnp.int32)
            dst_nodes = offset[chunk] + (idx - prev[chunk])
            # TODO(synk): a run-length-coalesced chunk DMA variant would cut
            # descriptor count further; per-row DMAs keep it fully dynamic.
            self._push_flat(x, self._flat_ids(dst_nodes, layer))
            return

        # Row-id form.  (Duplicate ids assumed unique, as produced by
        # torch_geometric_autoscale batches; duplicates would race across
        # in-flight DMAs.)
        n_id = jnp.asarray(n_id, dtype=jnp.int32).reshape(-1)
        n = int(n_id.shape[0])
        if n == 0:
            return
        if int(x.shape[0]) > n:
            x = x[:n]
        self._push_flat(x, self._flat_ids(n_id, layer))

    def forward(self, *args, **kwargs):
        raise NotImplementedError


# ---------------------------------------------------------------------------
# Demo / smoke test
# ---------------------------------------------------------------------------

if __name__ == "__main__":
    num_nodes, num_layers, embedding_dim = 64, 2, 128
    hist = DBHistory(num_nodes, num_layers, embedding_dim)

    key = jax.random.PRNGKey(0)
    k1, k2 = jax.random.split(key)

    # push a batch of 8 node embeddings into layer 0 (row-id form)
    n_id = jnp.asarray([3, 17, 42, 0, 63, 8, 25, 9], dtype=jnp.int32)
    x = jax.random.normal(k1, (n_id.shape[0], embedding_dim), jnp.float32)
    hist.push(x, n_id=n_id, layer=0)

    # push via (offset, count) form into layer 1 (expanded on device)
    x2 = jax.random.normal(k2, (6, embedding_dim), jnp.float32)
    hist.push(x2, layer=1, offset=jnp.asarray([10, 40]), count=jnp.asarray([4, 2]))

    # pull back and verify round-trip
    out = jax.block_until_ready(hist.pull(n_id, layer=0))
    assert out.shape == (8, embedding_dim)
    assert bool(jnp.allclose(out, x, atol=0.0))

    out2 = jax.block_until_ready(
        hist.pull(jnp.asarray([10, 11, 12, 13, 40, 41], jnp.int32), layer=1))
    assert bool(jnp.allclose(out2, x2, atol=0.0))

    # untouched rows must remain zero: verifies the in-place alias really hit
    # the store (and that scatter did not clobber non-pushed rows)
    untouched = jax.block_until_ready(
        hist.pull(jnp.asarray([1, 2, 30, 50], jnp.int32), layer=0))
    assert bool(jnp.allclose(untouched, 0.0, atol=0.0))

    # single-node pull squeezes, matching the torch module
    single = jax.block_until_ready(hist.pull(jnp.asarray([42], jnp.int32), layer=0))
    assert single.shape == (embedding_dim,)
    assert bool(jnp.allclose(single, x[2], atol=0.0))

    # a larger pull exercises multi-step ("parallel") grids and id padding
    big_ids = jnp.arange(40, dtype=jnp.int32) % num_nodes
    big = jax.block_until_ready(hist.pull(big_ids, layer=0))
    assert big.shape == (40, embedding_dim)

    print("KERNEL_OK")
</pallas_src>

<mosaic_0001>
module attributes {stable_mosaic.version = 11 : i64} {
  func.func @_scatter_kernel(%arg0: i32, %arg1: memref<8xi32, #tpu.memory_space<smem>>, %arg2: memref<1xi32, #tpu.memory_space<smem>>, %arg3: memref<8x128xf32, #tpu.memory_space<any>>, %arg4: memref<128x128xf32, #tpu.memory_space<any>>, %arg5: memref<128x128xf32, #tpu.memory_space<any>>, %arg6: memref<32x!tpu.dma_semaphore, #tpu.memory_space<semaphore_mem>>) attributes {dimension_semantics = [#tpu.dimension_semantics<parallel>], iteration_bounds = array<i64: 1>, scalar_prefetch = 2 : i64, scratch_operands = 1 : i64, tpu.core_type = #tpu.core_type<tc>, window_params = [{}, {}, {}]} {
    %c8_i32 = arith.constant 8 : i32
    %0 = arith.muli %arg0, %c8_i32 : i32
    %c0 = arith.constant 0 : index
    %1 = memref.load %arg2[%c0] : memref<1xi32, #tpu.memory_space<smem>>
    %c1_i32 = arith.constant 1 : i32
    %2 = arith.subi %1, %c1_i32 : i32
    %c0_i32 = arith.constant 0 : i32
    %3 = arith.addi %0, %c0_i32 : i32
    %4 = arith.minsi %3, %2 : i32
    %5 = arith.index_cast %3 : i32 to index
    %6 = memref.load %arg1[%5] : memref<8xi32, #tpu.memory_space<smem>>
    %c0_i32_0 = arith.constant 0 : i32
    %7 = tpu.memref_slice %arg3[%4, %c0_i32_0] : memref<8x128xf32, #tpu.memory_space<any>> -> memref<1x128xf32, #tpu.memory_space<any>>
    %8 = tpu.memref_squeeze %7 : memref<1x128xf32, #tpu.memory_space<any>> -> memref<128xf32, #tpu.memory_space<any>>
    %c0_i32_1 = arith.constant 0 : i32
    %9 = tpu.memref_slice %arg5[%6, %c0_i32_1] : memref<128x128xf32, #tpu.memory_space<any>> -> memref<1x128xf32, #tpu.memory_space<any>>
    %10 = tpu.memref_squeeze %9 : memref<1x128xf32, #tpu.memory_space<any>> -> memref<128xf32, #tpu.memory_space<any>>
    %11 = tpu.memref_slice %arg6[%c0_i32] : memref<32x!tpu.dma_semaphore, #tpu.memory_space<semaphore_mem>> -> memref<1x!tpu.dma_semaphore, #tpu.memory_space<semaphore_mem>>
    %12 = tpu.memref_squeeze %11 : memref<1x!tpu.dma_semaphore, #tpu.memory_space<semaphore_mem>> -> memref<!tpu.dma_semaphore, #tpu.memory_space<semaphore_mem>>
    tpu.enqueue_dma source(%8 : memref<128xf32, #tpu.memory_space<any>>) target(%10 : memref<128xf32, #tpu.memory_space<any>>) target_semaphore(%12 : memref<!tpu.dma_semaphore, #tpu.memory_space<semaphore_mem>>)
    %c1_i32_2 = arith.constant 1 : i32
    %13 = arith.addi %0, %c1_i32_2 : i32
    %14 = arith.minsi %13, %2 : i32
    %15 = arith.index_cast %13 : i32 to index
    %16 = memref.load %arg1[%15] : memref<8xi32, #tpu.memory_space<smem>>
    %c0_i32_3 = arith.constant 0 : i32
    %17 = tpu.memref_slice %arg3[%14, %c0_i32_3] : memref<8x128xf32, #tpu.memory_space<any>> -> memref<1x128xf32, #tpu.memory_space<any>>
    %18 = tpu.memref_squeeze %17 : memref<1x128xf32, #tpu.memory_space<any>> -> memref<128xf32, #tpu.memory_space<any>>
    %c0_i32_4 = arith.constant 0 : i32
    %19 = tpu.memref_slice %arg5[%16, %c0_i32_4] : memref<128x128xf32, #tpu.memory_space<any>> -> memref<1x128xf32, #tpu.memory_space<any>>
    %20 = tpu.memref_squeeze %19 : memref<1x128xf32, #tpu.memory_space<any>> -> memref<128xf32, #tpu.memory_space<any>>
    %21 = tpu.memref_slice %arg6[%c1_i32_2] : memref<32x!tpu.dma_semaphore, #tpu.memory_space<semaphore_mem>> -> memref<1x!tpu.dma_semaphore, #tpu.memory_space<semaphore_mem>>
    %22 = tpu.memref_squeeze %21 : memref<1x!tpu.dma_semaphore, #tpu.memory_space<semaphore_mem>> -> memref<!tpu.dma_semaphore, #tpu.memory_space<semaphore_mem>>
    tpu.enqueue_dma source(%18 : memref<128xf32, #tpu.memory_space<any>>) target(%20 : memref<128xf32, #tpu.memory_space<any>>) target_semaphore(%22 : memref<!tpu.dma_semaphore, #tpu.memory_space<semaphore_mem>>)
    %c2_i32 = arith.constant 2 : i32
    %23 = arith.addi %0, %c2_i32 : i32
    %24 = arith.minsi %23, %2 : i32
    %25 = arith.index_cast %23 : i32 to index
    %26 = memref.load %arg1[%25] : memref<8xi32, #tpu.memory_space<smem>>
    %c0_i32_5 = arith.constant 0 : i32
    %27 = tpu.memref_slice %arg3[%24, %c0_i32_5] : memref<8x128xf32, #tpu.memory_space<any>> -> memref<1x128xf32, #tpu.memory_space<any>>
    %28 = tpu.memref_squeeze %27 : memref<1x128xf32, #tpu.memory_space<any>> -> memref<128xf32, #tpu.memory_space<any>>
    %c0_i32_6 = arith.constant 0 : i32
    %29 = tpu.memref_slice %arg5[%26, %c0_i32_6] : memref<128x128xf32, #tpu.memory_space<any>> -> memref<1x128xf32, #tpu.memory_space<any>>
    %30 = tpu.memref_squeeze %29 : memref<1x128xf32, #tpu.memory_space<any>> -> memref<128xf32, #tpu.memory_space<any>>
    %31 = tpu.memref_slice %arg6[%c2_i32] : memref<32x!tpu.dma_semaphore, #tpu.memory_space<semaphore_mem>> -> memref<1x!tpu.dma_semaphore, #tpu.memory_space<semaphore_mem>>
    %32 = tpu.memref_squeeze %31 : memref<1x!tpu.dma_semaphore, #tpu.memory_space<semaphore_mem>> -> memref<!tpu.dma_semaphore, #tpu.memory_space<semaphore_mem>>
    tpu.enqueue_dma source(%28 : memref<128xf32, #tpu.memory_space<any>>) target(%30 : memref<128xf32, #tpu.memory_space<any>>) target_semaphore(%32 : memref<!tpu.dma_semaphore, #tpu.memory_space<semaphore_mem>>)
    %c3_i32 = arith.constant 3 : i32
    %33 = arith.addi %0, %c3_i32 : i32
    %34 = arith.minsi %33, %2 : i32
    %35 = arith.index_cast %33 : i32 to index
    %36 = memref.load %arg1[%35] : memref<8xi32, #tpu.memory_space<smem>>
    %c0_i32_7 = arith.constant 0 : i32
    %37 = tpu.memref_slice %arg3[%34, %c0_i32_7] : memref<8x128xf32, #tpu.memory_space<any>> -> memref<1x128xf32, #tpu.memory_space<any>>
    %38 = tpu.memref_squeeze %37 : memref<1x128xf32, #tpu.memory_space<any>> -> memref<128xf32, #tpu.memory_space<any>>
    %c0_i32_8 = arith.constant 0 : i32
    %39 = tpu.memref_slice %arg5[%36, %c0_i32_8] : memref<128x128xf32, #tpu.memory_space<any>> -> memref<1x128xf32, #tpu.memory_space<any>>
    %40 = tpu.memref_squeeze %39 : memref<1x128xf32, #tpu.memory_space<any>> -> memref<128xf32, #tpu.memory_space<any>>
    %41 = tpu.memref_slice %arg6[%c3_i32] : memref<32x!tpu.dma_semaphore, #tpu.memory_space<semaphore_mem>> -> memref<1x!tpu.dma_semaphore, #tpu.memory_space<semaphore_mem>>
    %42 = tpu.memref_squeeze %41 : memref<1x!tpu.dma_semaphore, #tpu.memory_space<semaphore_mem>> -> memref<!tpu.dma_semaphore, #tpu.memory_space<semaphore_mem>>
    tpu.enqueue_dma source(%38 : memref<128xf32, #tpu.memory_space<any>>) target(%40 : memref<128xf32, #tpu.memory_space<any>>) target_semaphore(%42 : memref<!tpu.dma_semaphore, #tpu.memory_space<semaphore_mem>>)
    %c4_i32 = arith.constant 4 : i32
    %43 = arith.addi %0, %c4_i32 : i32
    %44 = arith.minsi %43, %2 : i32
    %45 = arith.index_cast %43 : i32 to index
    %46 = memref.load %arg1[%45] : memref<8xi32, #tpu.memory_space<smem>>
    %c0_i32_9 = arith.constant 0 : i32
    %47 = tpu.memref_slice %arg3[%44, %c0_i32_9] : memref<8x128xf32, #tpu.memory_space<any>> -> memref<1x128xf32, #tpu.memory_space<any>>
    %48 = tpu.memref_squeeze %47 : memref<1x128xf32, #tpu.memory_space<any>> -> memref<128xf32, #tpu.memory_space<any>>
    %c0_i32_10 = arith.constant 0 : i32
    %49 = tpu.memref_slice %arg5[%46, %c0_i32_10] : memref<128x128xf32, #tpu.memory_space<any>> -> memref<1x128xf32, #tpu.memory_space<any>>
    %50 = tpu.memref_squeeze %49 : memref<1x128xf32, #tpu.memory_space<any>> -> memref<128xf32, #tpu.memory_space<any>>
    %51 = tpu.memref_slice %arg6[%c4_i32] : memref<32x!tpu.dma_semaphore, #tpu.memory_space<semaphore_mem>> -> memref<1x!tpu.dma_semaphore, #tpu.memory_space<semaphore_mem>>
    %52 = tpu.memref_squeeze %51 : memref<1x!tpu.dma_semaphore, #tpu.memory_space<semaphore_mem>> -> memref<!tpu.dma_semaphore, #tpu.memory_space<semaphore_mem>>
    tpu.enqueue_dma source(%48 : memref<128xf32, #tpu.memory_space<any>>) target(%50 : memref<128xf32, #tpu.memory_space<any>>) target_semaphore(%52 : memref<!tpu.dma_semaphore, #tpu.memory_space<semaphore_mem>>)
    %c5_i32 = arith.constant 5 : i32
    %53 = arith.addi %0, %c5_i32 : i32
    %54 = arith.minsi %53, %2 : i32
    %55 = arith.index_cast %53 : i32 to index
    %56 = memref.load %arg1[%55] : memref<8xi32, #tpu.memory_space<smem>>
    %c0_i32_11 = arith.constant 0 : i32
    %57 = tpu.memref_slice %arg3[%54, %c0_i32_11] : memref<8x128xf32, #tpu.memory_space<any>> -> memref<1x128xf32, #tpu.memory_space<any>>
    %58 = tpu.memref_squeeze %57 : memref<1x128xf32, #tpu.memory_space<any>> -> memref<128xf32, #tpu.memory_space<any>>
    %c0_i32_12 = arith.constant 0 : i32
    %59 = tpu.memref_slice %arg5[%56, %c0_i32_12] : memref<128x128xf32, #tpu.memory_space<any>> -> memref<1x128xf32, #tpu.memory_space<any>>
    %60 = tpu.memref_squeeze %59 : memref<1x128xf32, #tpu.memory_space<any>> -> memref<128xf32, #tpu.memory_space<any>>
    %61 = tpu.memref_slice %arg6[%c5_i32] : memref<32x!tpu.dma_semaphore, #tpu.memory_space<semaphore_mem>> -> memref<1x!tpu.dma_semaphore, #tpu.memory_space<semaphore_mem>>
    %62 = tpu.memref_squeeze %61 : memref<1x!tpu.dma_semaphore, #tpu.memory_space<semaphore_mem>> -> memref<!tpu.dma_semaphore, #tpu.memory_space<semaphore_mem>>
    tpu.enqueue_dma source(%58 : memref<128xf32, #tpu.memory_space<any>>) target(%60 : memref<128xf32, #tpu.memory_space<any>>) target_semaphore(%62 : memref<!tpu.dma_semaphore, #tpu.memory_space<semaphore_mem>>)
    %c6_i32 = arith.constant 6 : i32
    %63 = arith.addi %0, %c6_i32 : i32
    %64 = arith.minsi %63, %2 : i32
    %65 = arith.index_cast %63 : i32 to index
    %66 = memref.load %arg1[%65] : memref<8xi32, #tpu.memory_space<smem>>
    %c0_i32_13 = arith.constant 0 : i32
    %67 = tpu.memref_slice %arg3[%64, %c0_i32_13] : memref<8x128xf32, #tpu.memory_space<any>> -> memref<1x128xf32, #tpu.memory_space<any>>
    %68 = tpu.memref_squeeze %67 : memref<1x128xf32, #tpu.memory_space<any>> -> memref<128xf32, #tpu.memory_space<any>>
    %c0_i32_14 = arith.constant 0 : i32
    %69 = tpu.memref_slice %arg5[%66, %c0_i32_14] : memref<128x128xf32, #tpu.memory_space<any>> -> memref<1x128xf32, #tpu.memory_space<any>>
    %70 = tpu.memref_squeeze %69 : memref<1x128xf32, #tpu.memory_space<any>> -> memref<128xf32, #tpu.memory_space<any>>
    %71 = tpu.memref_slice %arg6[%c6_i32] : memref<32x!tpu.dma_semaphore, #tpu.memory_space<semaphore_mem>> -> memref<1x!tpu.dma_semaphore, #tpu.memory_space<semaphore_mem>>
    %72 = tpu.memref_squeeze %71 : memref<1x!tpu.dma_semaphore, #tpu.memory_space<semaphore_mem>> -> memref<!tpu.dma_semaphore, #tpu.memory_space<semaphore_mem>>
    tpu.enqueue_dma source(%68 : memref<128xf32, #tpu.memory_space<any>>) target(%70 : memref<128xf32, #tpu.memory_space<any>>) target_semaphore(%72 : memref<!tpu.dma_semaphore, #tpu.memory_space<semaphore_mem>>)
    %c7_i32 = arith.constant 7 : i32
    %73 = arith.addi %0, %c7_i32 : i32
    %74 = arith.minsi %73, %2 : i32
    %75 = arith.index_cast %73 : i32 to index
    %76 = memref.load %arg1[%75] : memref<8xi32, #tpu.memory_space<smem>>
    %c0_i32_15 = arith.constant 0 : i32
    %77 = tpu.memref_slice %arg3[%74, %c0_i32_15] : memref<8x128xf32, #tpu.memory_space<any>> -> memref<1x128xf32, #tpu.memory_space<any>>
    %78 = tpu.memref_squeeze %77 : memref<1x128xf32, #tpu.memory_space<any>> -> memref<128xf32, #tpu.memory_space<any>>
    %c0_i32_16 = arith.constant 0 : i32
    %79 = tpu.memref_slice %arg5[%76, %c0_i32_16] : memref<128x128xf32, #tpu.memory_space<any>> -> memref<1x128xf32, #tpu.memory_space<any>>
    %80 = tpu.memref_squeeze %79 : memref<1x128xf32, #tpu.memory_space<any>> -> memref<128xf32, #tpu.memory_space<any>>
    %81 = tpu.memref_slice %arg6[%c7_i32] : memref<32x!tpu.dma_semaphore, #tpu.memory_space<semaphore_mem>> -> memref<1x!tpu.dma_semaphore, #tpu.memory_space<semaphore_mem>>
    %82 = tpu.memref_squeeze %81 : memref<1x!tpu.dma_semaphore, #tpu.memory_space<semaphore_mem>> -> memref<!tpu.dma_semaphore, #tpu.memory_space<semaphore_mem>>
    tpu.enqueue_dma source(%78 : memref<128xf32, #tpu.memory_space<any>>) target(%80 : memref<128xf32, #tpu.memory_space<any>>) target_semaphore(%82 : memref<!tpu.dma_semaphore, #tpu.memory_space<semaphore_mem>>)
    %c8_i32_17 = arith.constant 8 : i32
    %c0_i32_18 = arith.constant 0 : i32
    %c0_i32_19 = arith.constant 0 : i32
    %c0_i32_20 = arith.constant 0 : i32
    %c0_i32_21 = arith.constant 0 : i32
    %83 = tpu.memref_slice %arg3[%c0_i32_19, %c0_i32_21] : memref<8x128xf32, #tpu.memory_space<any>> -> memref<1x128xf32, #tpu.memory_space<any>>
    %84 = tpu.memref_squeeze %83 : memref<1x128xf32, #tpu.memory_space<any>> -> memref<128xf32, #tpu.memory_space<any>>
    %c0_i32_22 = arith.constant 0 : i32
    %85 = tpu.memref_slice %arg5[%c0_i32_20, %c0_i32_22] : memref<128x128xf32, #tpu.memory_space<any>> -> memref<1x128xf32, #tpu.memory_space<any>>
    %86 = tpu.memref_squeeze %85 : memref<1x128xf32, #tpu.memory_space<any>> -> memref<128xf32, #tpu.memory_space<any>>
    %87 = tpu.memref_slice %arg6[%c0_i32_18] : memref<32x!tpu.dma_semaphore, #tpu.memory_space<semaphore_mem>> -> memref<1x!tpu.dma_semaphore, #tpu.memory_space<semaphore_mem>>
    %88 = tpu.memref_squeeze %87 : memref<1x!tpu.dma_semaphore, #tpu.memory_space<semaphore_mem>> -> memref<!tpu.dma_semaphore, #tpu.memory_space<semaphore_mem>>
    tpu.wait_dma2 semaphore(%88 : memref<!tpu.dma_semaphore, #tpu.memory_space<semaphore_mem>>) src(%84 : memref<128xf32, #tpu.memory_space<any>>) dst(%86 : memref<128xf32, #tpu.memory_space<any>>)
    %c1_i32_23 = arith.constant 1 : i32
    %c0_i32_24 = arith.constant 0 : i32
    %c0_i32_25 = arith.constant 0 : i32
    %c0_i32_26 = arith.constant 0 : i32
    %89 = tpu.memref_slice %arg3[%c0_i32_24, %c0_i32_26] : memref<8x128xf32, #tpu.memory_space<any>> -> memref<1x128xf32, #tpu.memory_space<any>>
    %90 = tpu.memref_squeeze %89 : memref<1x128xf32, #tpu.memory_space<any>> -> memref<128xf32, #tpu.memory_space<any>>
    %c0_i32_27 = arith.constant 0 : i32
    %91 = tpu.memref_slice %arg5[%c0_i32_25, %c0_i32_27] : memref<128x128xf32, #tpu.memory_space<any>> -> memref<1x128xf32, #tpu.memory_space<any>>
    %92 = tpu.memref_squeeze %91 : memref<1x128xf32, #tpu.memory_space<any>> -> memref<128xf32, #tpu.memory_space<any>>
    %93 = tpu.memref_slice %arg6[%c1_i32_23] : memref<32x!tpu.dma_semaphore, #tpu.memory_space<semaphore_mem>> -> memref<1x!tpu.dma_semaphore, #tpu.memory_space<semaphore_mem>>
    %94 = tpu.memref_squeeze %93 : memref<1x!tpu.dma_semaphore, #tpu.memory_space<semaphore_mem>> -> memref<!tpu.dma_semaphore, #tpu.memory_space<semaphore_mem>>
    tpu.wait_dma2 semaphore(%94 : memref<!tpu.dma_semaphore, #tpu.memory_space<semaphore_mem>>) src(%90 : memref<128xf32, #tpu.memory_space<any>>) dst(%92 : memref<128xf32, #tpu.memory_space<any>>)
    %c2_i32_28 = arith.constant 2 : i32
    %c0_i32_29 = arith.constant 0 : i32
    %c0_i32_30 = arith.constant 0 : i32
    %c0_i32_31 = arith.constant 0 : i32
    %95 = tpu.memref_slice %arg3[%c0_i32_29, %c0_i32_31] : memref<8x128xf32, #tpu.memory_space<any>> -> memref<1x128xf32, #tpu.memory_space<any>>
    %96 = tpu.memref_squeeze %95 : memref<1x128xf32, #tpu.memory_space<any>> -> memref<128xf32, #tpu.memory_space<any>>
    %c0_i32_32 = arith.constant 0 : i32
    %97 = tpu.memref_slice %arg5[%c0_i32_30, %c0_i32_32] : memref<128x128xf32, #tpu.memory_space<any>> -> memref<1x128xf32, #tpu.memory_space<any>>
    %98 = tpu.memref_squeeze %97 : memref<1x128xf32, #tpu.memory_space<any>> -> memref<128xf32, #tpu.memory_space<any>>
    %99 = tpu.memref_slice %arg6[%c2_i32_28] : memref<32x!tpu.dma_semaphore, #tpu.memory_space<semaphore_mem>> -> memref<1x!tpu.dma_semaphore, #tpu.memory_space<semaphore_mem>>
    %100 = tpu.memref_squeeze %99 : memref<1x!tpu.dma_semaphore, #tpu.memory_space<semaphore_mem>> -> memref<!tpu.dma_semaphore, #tpu.memory_space<semaphore_mem>>
    tpu.wait_dma2 semaphore(%100 : memref<!tpu.dma_semaphore, #tpu.memory_space<semaphore_mem>>) src(%96 : memref<128xf32, #tpu.memory_space<any>>) dst(%98 : memref<128xf32, #tpu.memory_space<any>>)
    %c3_i32_33 = arith.constant 3 : i32
    %c0_i32_34 = arith.constant 0 : i32
    %c0_i32_35 = arith.constant 0 : i32
    %c0_i32_36 = arith.constant 0 : i32
    %101 = tpu.memref_slice %arg3[%c0_i32_34, %c0_i32_36] : memref<8x128xf32, #tpu.memory_space<any>> -> memref<1x128xf32, #tpu.memory_space<any>>
    %102 = tpu.memref_squeeze %101 : memref<1x128xf32, #tpu.memory_space<any>> -> memref<128xf32, #tpu.memory_space<any>>
    %c0_i32_37 = arith.constant 0 : i32
    %103 = tpu.memref_slice %arg5[%c0_i32_35, %c0_i32_37] : memref<128x128xf32, #tpu.memory_space<any>> -> memref<1x128xf32, #tpu.memory_space<any>>
    %104 = tpu.memref_squeeze %103 : memref<1x128xf32, #tpu.memory_space<any>> -> memref<128xf32, #tpu.memory_space<any>>
    %105 = tpu.memref_slice %arg6[%c3_i32_33] : memref<32x!tpu.dma_semaphore, #tpu.memory_space<semaphore_mem>> -> memref<1x!tpu.dma_semaphore, #tpu.memory_space<semaphore_mem>>
    %106 = tpu.memref_squeeze %105 : memref<1x!tpu.dma_semaphore, #tpu.memory_space<semaphore_mem>> -> memref<!tpu.dma_semaphore, #tpu.memory_space<semaphore_mem>>
    tpu.wait_dma2 semaphore(%106 : memref<!tpu.dma_semaphore, #tpu.memory_space<semaphore_mem>>) src(%102 : memref<128xf32, #tpu.memory_space<any>>) dst(%104 : memref<128xf32, #tpu.memory_space<any>>)
    %c4_i32_38 = arith.constant 4 : i32
    %c0_i32_39 = arith.constant 0 : i32
    %c0_i32_40 = arith.constant 0 : i32
    %c0_i32_41 = arith.constant 0 : i32
    %107 = tpu.memref_slice %arg3[%c0_i32_39, %c0_i32_41] : memref<8x128xf32, #tpu.memory_space<any>> -> memref<1x128xf32, #tpu.memory_space<any>>
    %108 = tpu.memref_squeeze %107 : memref<1x128xf32, #tpu.memory_space<any>> -> memref<128xf32, #tpu.memory_space<any>>
    %c0_i32_42 = arith.constant 0 : i32
    %109 = tpu.memref_slice %arg5[%c0_i32_40, %c0_i32_42] : memref<128x128xf32, #tpu.memory_space<any>> -> memref<1x128xf32, #tpu.memory_space<any>>
    %110 = tpu.memref_squeeze %109 : memref<1x128xf32, #tpu.memory_space<any>> -> memref<128xf32, #tpu.memory_space<any>>
    %111 = tpu.memref_slice %arg6[%c4_i32_38] : memref<32x!tpu.dma_semaphore, #tpu.memory_space<semaphore_mem>> -> memref<1x!tpu.dma_semaphore, #tpu.memory_space<semaphore_mem>>
    %112 = tpu.memref_squeeze %111 : memref<1x!tpu.dma_semaphore, #tpu.memory_space<semaphore_mem>> -> memref<!tpu.dma_semaphore, #tpu.memory_space<semaphore_mem>>
    tpu.wait_dma2 semaphore(%112 : memref<!tpu.dma_semaphore, #tpu.memory_space<semaphore_mem>>) src(%108 : memref<128xf32, #tpu.memory_space<any>>) dst(%110 : memref<128xf32, #tpu.memory_space<any>>)
    %c5_i32_43 = arith.constant 5 : i32
    %c0_i32_44 = arith.constant 0 : i32
    %c0_i32_45 = arith.constant 0 : i32
    %c0_i32_46 = arith.constant 0 : i32
    %113 = tpu.memref_slice %arg3[%c0_i32_44, %c0_i32_46] : memref<8x128xf32, #tpu.memory_space<any>> -> memref<1x128xf32, #tpu.memory_space<any>>
    %114 = tpu.memref_squeeze %113 : memref<1x128xf32, #tpu.memory_space<any>> -> memref<128xf32, #tpu.memory_space<any>>
    %c0_i32_47 = arith.constant 0 : i32
    %115 = tpu.memref_slice %arg5[%c0_i32_45, %c0_i32_47] : memref<128x128xf32, #tpu.memory_space<any>> -> memref<1x128xf32, #tpu.memory_space<any>>
    %116 = tpu.memref_squeeze %115 : memref<1x128xf32, #tpu.memory_space<any>> -> memref<128xf32, #tpu.memory_space<any>>
    %117 = tpu.memref_slice %arg6[%c5_i32_43] : memref<32x!tpu.dma_semaphore, #tpu.memory_space<semaphore_mem>> -> memref<1x!tpu.dma_semaphore, #tpu.memory_space<semaphore_mem>>
    %118 = tpu.memref_squeeze %117 : memref<1x!tpu.dma_semaphore, #tpu.memory_space<semaphore_mem>> -> memref<!tpu.dma_semaphore, #tpu.memory_space<semaphore_mem>>
    tpu.wait_dma2 semaphore(%118 : memref<!tpu.dma_semaphore, #tpu.memory_space<semaphore_mem>>) src(%114 : memref<128xf32, #tpu.memory_space<any>>) dst(%116 : memref<128xf32, #tpu.memory_space<any>>)
    %c6_i32_48 = arith.constant 6 : i32
    %c0_i32_49 = arith.constant 0 : i32
    %c0_i32_50 = arith.constant 0 : i32
    %c0_i32_51 = arith.constant 0 : i32
    %119 = tpu.memref_slice %arg3[%c0_i32_49, %c0_i32_51] : memref<8x128xf32, #tpu.memory_space<any>> -> memref<1x128xf32, #tpu.memory_space<any>>
    %120 = tpu.memref_squeeze %119 : memref<1x128xf32, #tpu.memory_space<any>> -> memref<128xf32, #tpu.memory_space<any>>
    %c0_i32_52 = arith.constant 0 : i32
    %121 = tpu.memref_slice %arg5[%c0_i32_50, %c0_i32_52] : memref<128x128xf32, #tpu.memory_space<any>> -> memref<1x128xf32, #tpu.memory_space<any>>
    %122 = tpu.memref_squeeze %121 : memref<1x128xf32, #tpu.memory_space<any>> -> memref<128xf32, #tpu.memory_space<any>>
    %123 = tpu.memref_slice %arg6[%c6_i32_48] : memref<32x!tpu.dma_semaphore, #tpu.memory_space<semaphore_mem>> -> memref<1x!tpu.dma_semaphore, #tpu.memory_space<semaphore_mem>>
    %124 = tpu.memref_squeeze %123 : memref<1x!tpu.dma_semaphore, #tpu.memory_space<semaphore_mem>> -> memref<!tpu.dma_semaphore, #tpu.memory_space<semaphore_mem>>
    tpu.wait_dma2 semaphore(%124 : memref<!tpu.dma_semaphore, #tpu.memory_space<semaphore_mem>>) src(%120 : memref<128xf32, #tpu.memory_space<any>>) dst(%122 : memref<128xf32, #tpu.memory_space<any>>)
    %c7_i32_53 = arith.constant 7 : i32
    %c0_i32_54 = arith.constant 0 : i32
    %c0_i32_55 = arith.constant 0 : i32
    %c0_i32_56 = arith.constant 0 : i32
    %125 = tpu.memref_slice %arg3[%c0_i32_54, %c0_i32_56] : memref<8x128xf32, #tpu.memory_space<any>> -> memref<1x128xf32, #tpu.memory_space<any>>
    %126 = tpu.memref_squeeze %125 : memref<1x128xf32, #tpu.memory_space<any>> -> memref<128xf32, #tpu.memory_space<any>>
    %c0_i32_57 = arith.constant 0 : i32
    %127 = tpu.memref_slice %arg5[%c0_i32_55, %c0_i32_57] : memref<128x128xf32, #tpu.memory_space<any>> -> memref<1x128xf32, #tpu.memory_space<any>>
    %128 = tpu.memref_squeeze %127 : memref<1x128xf32, #tpu.memory_space<any>> -> memref<128xf32, #tpu.memory_space<any>>
    %129 = tpu.memref_slice %arg6[%c7_i32_53] : memref<32x!tpu.dma_semaphore, #tpu.memory_space<semaphore_mem>> -> memref<1x!tpu.dma_semaphore, #tpu.memory_space<semaphore_mem>>
    %130 = tpu.memref_squeeze %129 : memref<1x!tpu.dma_semaphore, #tpu.memory_space<semaphore_mem>> -> memref<!tpu.dma_semaphore, #tpu.memory_space<semaphore_mem>>
    tpu.wait_dma2 semaphore(%130 : memref<!tpu.dma_semaphore, #tpu.memory_space<semaphore_mem>>) src(%126 : memref<128xf32, #tpu.memory_space<any>>) dst(%128 : memref<128xf32, #tpu.memory_space<any>>)
    %c8_i32_58 = arith.constant 8 : i32
    return
  }
}

</mosaic_0001>

<bundles_post_ra>
// kernel: _push_rows.1
= control target key start
LH: loop header
LB: loop body
LE: loop exit
PB: predicated region body
PF: predicated region fallthrough
CT: control target
= control target key end

     0   :  { %s699_s0 = inlined_call_operand.vmem [shape: s32[8], index: 0, kind: input, shape index: {}]   ;;  %s700_s1 = inlined_call_operand.<no memory space> [shape: s32[1], index: 1, kind: input, shape index: {}]   ;;  %s701_s2 = inlined_call_operand.hbm [shape: f32[8,128], index: 2, kind: input, shape index: {}]   ;;  %s702_s3 = inlined_call_operand.hbm [shape: f32[128,128], index: 3, kind: input, shape index: {}, may-alias: {3,4}]   ;;  %s703_s4 = inlined_call_operand.hbm [shape: f32[128,128], index: 4, kind: output, shape index: {}, may-alias: {3,4}]  }
   0x1   :  { %s9_s17 = sshll.u32 %s699_s0, 4  ;;  %s10_s17 = int_to_ptr.vmem [resolvable:$true] %s9_s17 }
   0x2   :  { %s546_s18 = scalar_lea.vmem %s10_s17, 16  ;;  %p551_p1 = scmp.lt.s32.totalorder %s10_s17, %s10_s17 }
   0x3   :  { %p547_p0 = scmp.ne.s32.totalorder %s10_s17, %s546_s18  ;;  %p552_p2 = scmp.lt.s32.totalorder %s546_s18, %s546_s18 }
   0x5   :  { %p553_p3 = por %p552_p2, %p551_p1 }
   0x7   :  { %p554_p4 = pnand %p553_p3, %p547_p0 }
   0x9   :  { %557 = shalt.err (!%p554_p4)  }
   0xa   :  { %s576_s19 = smov [#allocation4]  }
   0xb   :  { %12 = dma.vmem_to_smem %s10_s17, 16, %s576_s19, [#allocation3] }
   0xc   :  { %558 = dma.done.wait [#allocation3], 16 }
   0xd   :  { %559 = vsyncadd [#allocation3], 4294967280 }
   0xe   :  { %15 = sfence }
   0xf   :  { %s625_s21 = sadd.s32 4294967295, %s700_s1  ;;  %s21_s0 = sld [smem:[#allocation4]] }
  0x10   :  { %p465_p5 = scmp.gt.s32.totalorder %s625_s21, 0  ;;  %p468_p6 = scmp.gt.s32.totalorder %s625_s21, 1 }
  0x11   :  { %s577_s30 = smov [#allocation2]   ;;  %s578_s5 = smov [#allocation6]  }
  0x12   :  { %s20_s22 = scalar_select %p465_p5, 0, %s625_s21 }
  0x13   :  { %s579_s6 = smov 0   ;;  %p472_p7 = scmp.gt.s32.totalorder %s625_s21, 2 }
  0x14   :  { %s466_s23 = sshll.u32 %s20_s22, 4  ;;  %s580_s18 = smov [#allocation2 + $0x1]  }
  0x15   :  { %s23_s26 = scalar_lea.hbm %s701_s2, %s466_s23  ;;  %s467_s27 = sshll.u32 %s21_s0, 4 }
  0x16   :  { %s25_s1 = scalar_lea.hbm %s703_s4, %s467_s27  ;;  %s581_s19 = smov [#allocation8]  }
  0x17   :  { %38 = dma.general %s23_s26, 16, %s25_s1, %s577_s30, %s578_s5, [#allocation7], %s579_s6, 0  }
  0x18   :  { %s469_s7 = sld [smem:[#allocation4 + $0x1]]  ;;  %p476_p8 = scmp.gt.s32.totalorder %s625_s21, 3 }
  0x19   :  { %s41_s8 = scalar_select %p468_p6, 1, %s625_s21 }
  0x1a   :  { %s63_s10 = scalar_select %p472_p7, 2, %s625_s21 }
  0x1b   :  { %s470_s9 = sshll.u32 %s41_s8, 4  ;;  %s582_s29 = smov [#allocation2 + $0x2]  }
  0x1c   :  { %s44_s13 = scalar_lea.hbm %s701_s2, %s470_s9  ;;  %s474_s20 = sshll.u32 %s63_s10, 4 }
  0x1d   :  { %s66_s23 = scalar_lea.hbm %s701_s2, %s474_s20  ;;  %s583_s1 = smov [#allocation10]  }
  0x1e   :  { %s471_s14 = sshll.u32 %s469_s7, 4  ;;  %p480_p9 = scmp.gt.s32.totalorder %s625_s21, 4 }
  0x1f   :  { %s46_s17 = scalar_lea.hbm %s703_s4, %s471_s14  ;;  %s584_s15 = smov [#allocation2 + $0x3]  }
  0x20   :  { %60 = dma.general %s44_s13, 16, %s46_s17, %s580_s18, %s581_s19, [#allocation9], %s579_s6, 0  }
  0x21   :  { %s473_s3 = sld [smem:[#allocation4 + $0x2]]  ;;  %s585_s16 = smov [#allocation12]  }
  0x22   :  { %s85_s24 = scalar_select %p476_p8, 3, %s625_s21 }
  0x23   :  { %s107_s7 = scalar_select %p480_p9, 4, %s625_s21 }
  0x24   :  { %s478_s5 = sshll.u32 %s85_s24, 4  ;;  %p484_p10 = scmp.gt.s32.totalorder %s625_s21, 5 }
  0x25   :  { %s88_s10 = scalar_lea.hbm %s701_s2, %s478_s5  ;;  %s482_s18 = sshll.u32 %s107_s7, 4 }
  0x26   :  { %s110_s20 = scalar_lea.hbm %s701_s2, %s482_s18  ;;  %s586_s26 = smov [#allocation2 + $0x4]  }
  0x27   :  { %s475_s25 = sshll.u32 %s473_s3, 4  ;;  %s587_s27 = smov [#allocation14]  }
  0x28   :  { %s68_s28 = scalar_lea.hbm %s703_s4, %s475_s25  ;;  %p488_p11 = scmp.gt.s32.totalorder %s625_s21, 6 }
  0x29   :  { %82 = dma.general %s66_s23, 16, %s68_s28, %s582_s29, %s583_s1, [#allocation11], %s579_s6, 0  }
  0x2a   :  { %s477_s30 = sld [smem:[#allocation4 + $0x3]]  ;;  %s588_s12 = smov [#allocation2 + $0x5]  }
  0x2b   :  { %s129_s0 = scalar_select %p484_p10, 5, %s625_s21 }
  0x2c   :  { %s151_s7 = scalar_select %p488_p11, 6, %s625_s21 }
  0x2d   :  { %s486_s29 = sshll.u32 %s129_s0, 4  ;;  %s589_s13 = smov [#allocation16]  }
  0x2e   :  { %s132_s5 = scalar_lea.hbm %s701_s2, %s486_s29  ;;  %p492_p12 = scmp.gt.s32.totalorder %s625_s21, 7 }
  0x2f   :  { %s591_s23 = smov [#allocation18]  }
  0x30   :  { %s479_s11 = sshll.u32 %s477_s30, 4  ;;  %s705_s21 = smov (%p492_p12, %s625_s21), 7 }
  0x31   :  { %s90_s14 = scalar_lea.hbm %s703_s4, %s479_s11 }
  0x32   :  { %104 = dma.general %s88_s10, 16, %s90_s14, %s584_s15, %s585_s16, [#allocation13], %s579_s6, 0  }
  0x33   :  { %s481_s17 = sld [smem:[#allocation4 + $0x4]]  ;;  %s490_s15 = sshll.u32 %s151_s7, 4 }
  0x34   :  { %s154_s18 = scalar_lea.hbm %s701_s2, %s490_s15  ;;  %s592_s7 = smov [#allocation2 + $0x7]  }
  0x39   :  { %s483_s22 = sshll.u32 %s481_s17, 4 }
  0x3a   :  { %s112_s25 = scalar_lea.hbm %s703_s4, %s483_s22  ;;  %s590_s22 = smov [#allocation2 + $0x6]  }
  0x3b   :  { %126 = dma.general %s110_s20, 16, %s112_s25, %s586_s26, %s587_s27, [#allocation15], %s579_s6, 0  }
  0x3c   :  { %s485_s28 = sld [smem:[#allocation4 + $0x5]]  ;;  %s494_s25 = sshll.u32 %s705_s21, 4 }
  0x42   :  { %s487_s8 = sshll.u32 %s485_s28, 4  ;;  %s176_s28 = scalar_lea.hbm %s701_s2, %s494_s25 }
  0x43   :  { %s134_s11 = scalar_lea.hbm %s703_s4, %s487_s8  ;;  %s593_s8 = smov [#allocation20]  }
  0x44   :  { %148 = dma.general %s132_s5, 16, %s134_s11, %s588_s12, %s589_s13, [#allocation17], %s579_s6, 0  }
  0x45   :  { %s489_s14 = sld [smem:[#allocation4 + $0x6]] }
  0x4b   :  { %s491_s19 = sshll.u32 %s489_s14, 4 }
  0x4c   :  { %s156_s0 = scalar_lea.hbm %s703_s4, %s491_s19 }
  0x4d   :  { %170 = dma.general %s154_s18, 16, %s156_s0, %s590_s22, %s591_s23, [#allocation19], %s579_s6, 0  }
  0x4e   :  { %s493_s24 = sld [smem:[#allocation4 + $0x7]] }
  0x54   :  { %s495_s29 = sshll.u32 %s493_s24, 4 }
  0x55   :  { %s178_s5 = scalar_lea.hbm %s703_s4, %s495_s29 }
  0x56   :  { %192 = dma.general %s176_s28, 16, %s178_s5, %s592_s7, %s593_s8, [#allocation21], %s579_s6, 0  }
  0x57   :  { %560 = dma.done.wait [#allocation2], 16 }
  0x58   :  { %561 = vsyncadd [#allocation2], 4294967280 }
  0x59   :  { %562 = dma.done.wait [#allocation2 + $0x1], 16 }
  0x5a   :  { %563 = vsyncadd [#allocation2 + $0x1], 4294967280 }
  0x5b   :  { %564 = dma.done.wait [#allocation2 + $0x2], 16 }
  0x5c   :  { %565 = vsyncadd [#allocation2 + $0x2], 4294967280 }
  0x5d   :  { %566 = dma.done.wait [#allocation2 + $0x3], 16 }
  0x5e   :  { %567 = vsyncadd [#allocation2 + $0x3], 4294967280 }
  0x5f   :  { %568 = dma.done.wait [#allocation2 + $0x4], 16 }
  0x60   :  { %569 = vsyncadd [#allocation2 + $0x4], 4294967280 }
  0x61   :  { %570 = dma.done.wait [#allocation2 + $0x5], 16 }
  0x62   :  { %571 = vsyncadd [#allocation2 + $0x5], 4294967280 }
  0x63   :  { %572 = dma.done.wait [#allocation2 + $0x6], 16 }
  0x64   :  { %573 = vsyncadd [#allocation2 + $0x6], 4294967280 }
  0x65   :  { %574 = dma.done.wait [#allocation2 + $0x7], 16 }
  0x66   :  { %575 = vsyncadd [#allocation2 + $0x7], 4294967280 }
  0x67   :  { %209 = vsyncmov [#allocation2] }
  0x6a   :  { %s210_s2 = vpop.sfrf %209 }
  0x6b   :  { %p496_p13 = scmp.ne.s32.totalorder %s210_s2, 0 }
  0x6d   :  { %214 = shalt.err (%p496_p13)  }
  0x6e   :  { %216 = vsyncmov [#allocation2 + $0x1] }
  0x71   :  { %s217_s4 = vpop.sfrf %216 }
  0x72   :  { %p497_p0 = scmp.ne.s32.totalorder %s217_s4, 0 }
  0x74   :  { %221 = shalt.err (%p497_p0)  }
  0x75   :  { %223 = vsyncmov [#allocation2 + $0x2] }
  0x78   :  { %s224_s21 = vpop.sfrf %223 }
  0x79   :  { %p498_p1 = scmp.ne.s32.totalorder %s224_s21, 0 }
  0x7b   :  { %228 = shalt.err (%p498_p1)  }
  0x7c   :  { %230 = vsyncmov [#allocation2 + $0x3] }
  0x7f   :  { %s231_s6 = vpop.sfrf %230 }
  0x80   :  { %p499_p2 = scmp.ne.s32.totalorder %s231_s6, 0 }
  0x82   :  { %235 = shalt.err (%p499_p2)  }
  0x83   :  { %237 = vsyncmov [#allocation2 + $0x4] }
  0x86   :  { %s238_s9 = vpop.sfrf %237 }
  0x87   :  { %p500_p3 = scmp.ne.s32.totalorder %s238_s9, 0 }
  0x89   :  { %242 = shalt.err (%p500_p3)  }
  0x8a   :  { %244 = vsyncmov [#allocation2 + $0x5] }
  0x8d   :  { %s245_s10 = vpop.sfrf %244 }
  0x8e   :  { %p501_p4 = scmp.ne.s32.totalorder %s245_s10, 0 }
  0x90   :  { %249 = shalt.err (%p501_p4)  }
  0x91   :  { %251 = vsyncmov [#allocation2 + $0x6] }
  0x94   :  { %s252_s11 = vpop.sfrf %251 }
  0x95   :  { %p502_p5 = scmp.ne.s32.totalorder %s252_s11, 0 }
  0x97   :  { %256 = shalt.err (%p502_p5)  }
  0x98   :  { %258 = vsyncmov [#allocation2 + $0x7] }
  0x9b   :  { %s259_s12 = vpop.sfrf %258 }
  0x9c   :  { %p503_p6 = scmp.ne.s32.totalorder %s259_s12, 0 }
  0x9e   :  { %263 = shalt.err (%p503_p6)  }
  0x9f   :  { %265 = vsyncmov [#allocation2 + $0x8] }
  0xa2   :  { %s266_s13 = vpop.sfrf %265 }
  0xa3   :  { %p504_p7 = scmp.ne.s32.totalorder %s266_s13, 0 }
  0xa5   :  { %270 = shalt.err (%p504_p7)  }
  0xa6   :  { %272 = vsyncmov [#allocation2 + $0x9] }
  0xa9   :  { %s273_s14 = vpop.sfrf %272 }
  0xaa   :  { %p505_p8 = scmp.ne.s32.totalorder %s273_s14, 0 }
  0xac   :  { %277 = shalt.err (%p505_p8)  }
  0xad   :  { %279 = vsyncmov [#allocation2 + $0xa] }
  0xb0   :  { %s280_s15 = vpop.sfrf %279 }
  0xb1   :  { %p506_p9 = scmp.ne.s32.totalorder %s280_s15, 0 }
  0xb3   :  { %284 = shalt.err (%p506_p9)  }
  0xb4   :  { %286 = vsyncmov [#allocation2 + $0xb] }
  0xb7   :  { %s287_s16 = vpop.sfrf %286 }
  0xb8   :  { %p507_p10 = scmp.ne.s32.totalorder %s287_s16, 0 }
  0xba   :  { %291 = shalt.err (%p507_p10)  }
  0xbb   :  { %293 = vsyncmov [#allocation2 + $0xc] }
  0xbe   :  { %s294_s17 = vpop.sfrf %293 }
  0xbf   :  { %p508_p11 = scmp.ne.s32.totalorder %s294_s17, 0 }
  0xc1   :  { %298 = shalt.err (%p508_p11)  }
  0xc2   :  { %300 = vsyncmov [#allocation2 + $0xd] }
  0xc5   :  { %s301_s18 = vpop.sfrf %300 }
  0xc6   :  { %p509_p12 = scmp.ne.s32.totalorder %s301_s18, 0 }
  0xc8   :  { %305 = shalt.err (%p509_p12)  }
  0xc9   :  { %307 = vsyncmov [#allocation2 + $0xe] }
  0xcc   :  { %s308_s19 = vpop.sfrf %307 }
  0xcd   :  { %p510_p13 = scmp.ne.s32.totalorder %s308_s19, 0 }
  0xcf   :  { %312 = shalt.err (%p510_p13)  }
  0xd0   :  { %314 = vsyncmov [#allocation2 + $0xf] }
  0xd3   :  { %s315_s3 = vpop.sfrf %314 }
  0xd4   :  { %p511_p0 = scmp.ne.s32.totalorder %s315_s3, 0 }
  0xd6   :  { %319 = shalt.err (%p511_p0)  }
  0xd7   :  { %321 = vsyncmov [#allocation2 + $0x10] }
  0xda   :  { %s322_s20 = vpop.sfrf %321 }
  0xdb   :  { %p512_p1 = scmp.ne.s32.totalorder %s322_s20, 0 }
  0xdd   :  { %326 = shalt.err (%p512_p1)  }
  0xde   :  { %328 = vsyncmov [#allocation2 + $0x11] }
  0xe1   :  { %s329_s0 = vpop.sfrf %328 }
  0xe2   :  { %p513_p2 = scmp.ne.s32.totalorder %s329_s0, 0 }
  0xe4   :  { %333 = shalt.err (%p513_p2)  }
  0xe5   :  { %335 = vsyncmov [#allocation2 + $0x12] }
  0xe8   :  { %s336_s22 = vpop.sfrf %335 }
  0xe9   :  { %p514_p3 = scmp.ne.s32.totalorder %s336_s22, 0 }
  0xeb   :  { %340 = shalt.err (%p514_p3)  }
  0xec   :  { %342 = vsyncmov [#allocation2 + $0x13] }
  0xef   :  { %s343_s23 = vpop.sfrf %342 }
  0xf0   :  { %p515_p4 = scmp.ne.s32.totalorder %s343_s23, 0 }
  0xf2   :  { %347 = shalt.err (%p515_p4)  }
  0xf3   :  { %349 = vsyncmov [#allocation2 + $0x14] }
  0xf6   :  { %s350_s24 = vpop.sfrf %349 }
  0xf7   :  { %p516_p5 = scmp.ne.s32.totalorder %s350_s24, 0 }
  0xf9   :  { %354 = shalt.err (%p516_p5)  }
  0xfa   :  { %356 = vsyncmov [#allocation2 + $0x15] }
  0xfd   :  { %s357_s25 = vpop.sfrf %356 }
  0xfe   :  { %p517_p6 = scmp.ne.s32.totalorder %s357_s25, 0 }
 0x100   :  { %361 = shalt.err (%p517_p6)  }
 0x101   :  { %363 = vsyncmov [#allocation2 + $0x16] }
 0x104   :  { %s364_s26 = vpop.sfrf %363 }
 0x105   :  { %p518_p7 = scmp.ne.s32.totalorder %s364_s26, 0 }
 0x107   :  { %368 = shalt.err (%p518_p7)  }
 0x108   :  { %370 = vsyncmov [#allocation2 + $0x17] }
 0x10b   :  { %s371_s27 = vpop.sfrf %370 }
 0x10c   :  { %p519_p8 = scmp.ne.s32.totalorder %s371_s27, 0 }
 0x10e   :  { %375 = shalt.err (%p519_p8)  }
 0x10f   :  { %377 = vsyncmov [#allocation2 + $0x18] }
 0x112   :  { %s378_s28 = vpop.sfrf %377 }
 0x113   :  { %p520_p9 = scmp.ne.s32.totalorder %s378_s28, 0 }
 0x115   :  { %382 = shalt.err (%p520_p9)  }
 0x116   :  { %384 = vsyncmov [#allocation2 + $0x19] }
 0x119   :  { %s385_s29 = vpop.sfrf %384 }
 0x11a   :  { %p521_p10 = scmp.ne.s32.totalorder %s385_s29, 0 }
 0x11c   :  { %389 = shalt.err (%p521_p10)  }
 0x11d   :  { %391 = vsyncmov [#allocation2 + $0x1a] }
 0x120   :  { %s392_s1 = vpop.sfrf %391 }
 0x121   :  { %p522_p11 = scmp.ne.s32.totalorder %s392_s1, 0 }
 0x123   :  { %396 = shalt.err (%p522_p11)  }
 0x124   :  { %398 = vsyncmov [#allocation2 + $0x1b] }
 0x127   :  { %s399_s30 = vpop.sfrf %398 }
 0x128   :  { %p523_p12 = scmp.ne.s32.totalorder %s399_s30, 0 }
 0x12a   :  { %403 = shalt.err (%p523_p12)  }
 0x12b   :  { %405 = vsyncmov [#allocation2 + $0x1c] }
 0x12e   :  { %s406_s5 = vpop.sfrf %405 }
 0x12f   :  { %p524_p13 = scmp.ne.s32.totalorder %s406_s5, 0 }
 0x131   :  { %410 = shalt.err (%p524_p13)  }
 0x132   :  { %412 = vsyncmov [#allocation2 + $0x1d] }
 0x135   :  { %s413_s7 = vpop.sfrf %412 }
 0x136   :  { %p525_p0 = scmp.ne.s32.totalorder %s413_s7, 0 }
 0x138   :  { %417 = shalt.err (%p525_p0)  }
 0x139   :  { %419 = vsyncmov [#allocation2 + $0x1e] }
 0x13c   :  { %s420_s8 = vpop.sfrf %419 }
 0x13d   :  { %p526_p1 = scmp.ne.s32.totalorder %s420_s8, 0 }
 0x13f   :  { %424 = shalt.err (%p526_p1)  }
 0x140   :  { %426 = vsyncmov [#allocation2 + $0x1f] }
 0x143   :  { %s427_s2 = vpop.sfrf %426 }
 0x144   :  { %p527_p2 = scmp.ne.s32.totalorder %s427_s2, 0 }
 0x146   :  { %431 = shalt.err (%p527_p2)  }

</bundles_post_ra>
